<compile_context>
chip_gen: v6e
topology: v6e:2x2x1
jax: 0.10.0
libtpu: 0.0.40
codegen_flags: <defaults>
</compile_context>

<pallas_src>
import jax
import jax.numpy as jnp
from jax.experimental import pallas as pl
from jax.experimental.pallas import tpu as pltpu


EMBED_DIM = 384   # sentence-transformers/paraphrase-multilingual-MiniLM-L12-v2
TEXT_CH = 64      # out_dim of the projection
LANE = 128        # TPU lane width (output padded to a multiple of this)


def _round_up(x, m):
    return ((x + m - 1) // m) * m


def _linear_kernel(x_ref, w_ref, b_ref, o_ref):
    # x_ref: (TB, E)  bf16
    # w_ref: (E, OP)  bf16   (resident across grid steps)
    # b_ref: (1, OP)  f32
    # o_ref: (TB, OP) f32    (lane-dense, OP multiple of 128)
    acc = jnp.dot(x_ref[...], w_ref[...], preferred_element_type=jnp.float32)
    o_ref[...] = (acc + b_ref[...]).astype(o_ref.dtype)


def text_encoder_project(embeddings, weight_t, bias, *, tile_b=512):
    """Pallas equivalent of `self.fc(embeddings)`.

    embeddings: [B, E] float32 (SBERT sentence embeddings)
    weight_t:   [E, O] float32 (transpose of PyTorch's [O, E] weight)
    bias:       [O] or [1, O] float32
    returns:    [B, O] float32
    """
    B, E = embeddings.shape
    O = weight_t.shape[1]
    OP = _round_up(max(O, LANE), LANE)               # lane-dense output width

    # Batch tile: big tiles for large B (mem-bound sweet spot >= 512 rows),
    # but never larger than the (sublane-rounded) batch itself.
    tb = min(tile_b, _round_up(B, 16))               # 16 = bf16 sublane packing
    Bp = _round_up(B, tb)

    # bf16 operands (MXU-native, halves activation HBM traffic); f32 accum.
    x = embeddings.astype(jnp.bfloat16)
    if Bp != B:
        x = jnp.pad(x, ((0, Bp - B), (0, 0)))
    w = jnp.zeros((E, OP), jnp.bfloat16).at[:, :O].set(weight_t.astype(jnp.bfloat16))
    b = jnp.zeros((1, OP), jnp.float32).at[:, :O].set(
        bias.reshape(1, O).astype(jnp.float32))

    out = pl.pallas_call(
        _linear_kernel,
        out_shape=jax.ShapeDtypeStruct((Bp, OP), jnp.float32),
        grid=(Bp // tb,),
        in_specs=[
            pl.BlockSpec((tb, E), lambda i: (i, 0)),   # stream batch tiles
            pl.BlockSpec((E, OP), lambda i: (0, 0)),   # weight resident
            pl.BlockSpec((1, OP), lambda i: (0, 0)),   # bias resident
        ],
        out_specs=pl.BlockSpec((tb, OP), lambda i: (i, 0)),
        compiler_params=pltpu.CompilerParams(
            # B axis is independent -> shard across TensorCores on v7x.
            dimension_semantics=("parallel",),
        ),
    )(x, w, b)

    return out[:B, :O]


def init_params(key, embedding_dim=EMBED_DIM, out_dim=TEXT_CH):
    """Deterministic init matching nn.Linear's default: U(-1/sqrt(in), 1/sqrt(in))."""
    kw, kb = jax.random.split(key)
    bound = 1.0 / jnp.sqrt(jnp.float32(embedding_dim))
    # PyTorch stores weight as [out, in]; we keep the transposed [in, out] layout.
    weight_t = jax.random.uniform(
        kw, (embedding_dim, out_dim), jnp.float32, minval=-bound, maxval=bound)
    bias = jax.random.uniform(
        kb, (1, out_dim), jnp.float32, minval=-bound, maxval=bound)
    return weight_t, bias


if __name__ == "__main__":
    key = jax.random.PRNGKey(0)
    k_emb, k_par = jax.random.split(key)

    batch = 8  # "number of texts"
    # Stand-in for SBERT embeddings of `texts` (model.encode output), [B, 384].
    embeddings = jax.random.normal(k_emb, (batch, EMBED_DIM), dtype=jnp.float32)

    weight_t, bias = init_params(k_par)

    out = text_encoder_project(embeddings, weight_t, bias)
    out = jax.block_until_ready(out)

    # Reference with the same operand precision (bf16 operands, f32 accumulate).
    ref = (
        jnp.dot(
            embeddings.astype(jnp.bfloat16).astype(jnp.float32),
            weight_t.astype(jnp.bfloat16).astype(jnp.float32),
        )
        + bias
    )
    assert out.shape == (batch, TEXT_CH)
    assert jnp.allclose(out, ref, atol=1e-3, rtol=1e-3)

    print("KERNEL_OK")
</pallas_src>

<mosaic_0001>
module attributes {stable_mosaic.version = 11 : i64} {
  func.func @_linear_kernel(%arg0: i32, %arg1: memref<16x384xbf16, #tpu.memory_space<vmem>>, %arg2: memref<384x128xbf16, #tpu.memory_space<vmem>>, %arg3: memref<1x128xf32, #tpu.memory_space<vmem>>, %arg4: memref<16x128xf32, #tpu.memory_space<vmem>>) attributes {dimension_semantics = [#tpu.dimension_semantics<parallel>], iteration_bounds = array<i64: 1>, scalar_prefetch = 0 : i64, scratch_operands = 0 : i64, tpu.core_type = #tpu.core_type<tc>, window_params = [{transform_indices = @transform_0, window_bounds = array<i64: 16, 384>}, {pipeline_mode = #tpu.pipeline_mode<synchronous>, transform_indices = @transform_1, window_bounds = array<i64: 384, 128>}, {pipeline_mode = #tpu.pipeline_mode<synchronous>, transform_indices = @transform_2, window_bounds = array<i64: 1, 128>}, {transform_indices = @transform_3, window_bounds = array<i64: 16, 128>}]} {
    %c0 = arith.constant 0 : index
    %c0_0 = arith.constant 0 : index
    %0 = vector.load %arg1[%c0, %c0_0] : memref<16x384xbf16, #tpu.memory_space<vmem>>, vector<16x384xbf16>
    %c0_1 = arith.constant 0 : index
    %c0_2 = arith.constant 0 : index
    %1 = vector.load %arg2[%c0_1, %c0_2] : memref<384x128xbf16, #tpu.memory_space<vmem>>, vector<384x128xbf16>
    %cst = arith.constant dense<0.000000e+00> : vector<16x128xf32>
    %2 = tpu.matmul %0, %1, %cst {dimension_numbers = #tpu.dot_dimension_numbers<[1], [0], [0], [1], [0, 0, 1, 1], [], []>} : vector<16x384xbf16>, vector<384x128xbf16>, vector<16x128xf32> -> vector<16x128xf32>
    %c0_3 = arith.constant 0 : index
    %c0_4 = arith.constant 0 : index
    %3 = vector.load %arg3[%c0_3, %c0_4] : memref<1x128xf32, #tpu.memory_space<vmem>>, vector<1x128xf32>
    %4 = vector.broadcast %3 : vector<1x128xf32> to vector<16x128xf32>
    %5 = arith.addf %2, %4 : vector<16x128xf32>
    %c0_5 = arith.constant 0 : index
    %c0_6 = arith.constant 0 : index
    %6 = vector.load %arg4[%c0_5, %c0_6] : memref<16x128xf32, #tpu.memory_space<vmem>>, vector<16x128xf32>
    tpu.vector_store %arg4[%c0_5, %c0_6], %5 {strides = array<i32>} : memref<16x128xf32, #tpu.memory_space<vmem>>, vector<16x128xf32>,
    return
  }
  func.func @transform_0(%arg0: i32) -> (i32, i32) {
    %c0_i32 = arith.constant 0 : i32
    %c0_i32_0 = arith.constant 0 : i32
    return %arg0, %c0_i32 : i32, i32
  }
  func.func @transform_1(%arg0: i32) -> (i32, i32) {
    %c0_i32 = arith.constant 0 : i32
    %c0_i32_0 = arith.constant 0 : i32
    %c0_i32_1 = arith.constant 0 : i32
    return %c0_i32, %c0_i32_0 : i32, i32
  }
  func.func @transform_2(%arg0: i32) -> (i32, i32) {
    %c0_i32 = arith.constant 0 : i32
    %c0_i32_0 = arith.constant 0 : i32
    %c0_i32_1 = arith.constant 0 : i32
    return %c0_i32, %c0_i32_0 : i32, i32
  }
  func.func @transform_3(%arg0: i32) -> (i32, i32) {
    %c0_i32 = arith.constant 0 : i32
    %c0_i32_0 = arith.constant 0 : i32
    return %arg0, %c0_i32 : i32, i32
  }
}

</mosaic_0001>

<bundles_post_ra>
// kernel: tpu_custom_call.1
= control target key start
LH: loop header
LB: loop body
LE: loop exit
PB: predicated region body
PF: predicated region fallthrough
CT: control target
= control target key end

     0   :  { %8 = vsyncpa [#allocation3], 0  ;;  %s592_s0 = inlined_call_operand.hbm [shape: bf16[16,384], index: 0, kind: input, shape index: {}]   ;;  %s593_s1 = inlined_call_operand.hbm [shape: bf16[384,128], index: 1, kind: input, shape index: {}]   ;;  %s594_s2 = inlined_call_operand.vmem [shape: f32[1,128], index: 2, kind: input, shape index: {}]   ;;  %s595_s3 = inlined_call_operand.hbm [shape: f32[16,128], index: 3, kind: output, shape index: {}]  }
   0x1   :  { %9 = vsyncpa [#allocation6], 0 }
   0x2   :  { %10 = vsyncpa [#allocation4], 0  ;;  %s549_s12 = smov [#allocation2]  }
   0x3   :  { %s16_s13 = sshll.u32 %s549_s12, 4  ;;  %s17_s13 = int_to_ptr.vmem [resolvable:$true] %s16_s13 }
   0x4   :  { %s491_s14 = scalar_lea.vmem %s17_s13, 384  ;;  %p496_p1 = scmp.lt.s32.totalorder %s17_s13, %s17_s13 }
   0x5   :  { %p492_p0 = scmp.ne.s32.totalorder %s17_s13, %s491_s14  ;;  %p497_p2 = scmp.lt.s32.totalorder %s491_s14, %s491_s14 }
   0x7   :  { %p498_p3 = por %p497_p2, %p496_p1 }
   0x9   :  { %p499_p4 = pnand %p498_p3, %p492_p0 }
   0xb   :  { %502 = shalt.err (!%p499_p4)
}
   0xc   :  { %s550_s15 = smov 192   ;;  %s551_s16 = smov 12  }
   0xd   :  { %22 = dma.hbm_to_vmem [thread:$0]  %s592_s0, 384, %s17_s13, [#allocation3], %s550_s15, %s550_s15, %s551_s16  }
   0xe   :  { %s552_s19 = smov [#allocation5]  }
   0xf   :  { %s28_s20 = sshll.u32 %s552_s19, 4  ;;  %s29_s20 = int_to_ptr.vmem [resolvable:$true] %s28_s20 }
  0x10   :  { %s511_s21 = scalar_lea.vmem %s29_s20, 3072  ;;  %p516_p6 = scmp.lt.s32.totalorder %s29_s20, %s29_s20 }
  0x11   :  { %p512_p5 = scmp.ne.s32.totalorder %s29_s20, %s511_s21  ;;  %p517_p7 = scmp.lt.s32.totalorder %s511_s21, %s511_s21 }
  0x13   :  { %p518_p8 = por %p517_p7, %p516_p6 }
  0x15   :  { %p519_p9 = pnand %p518_p8, %p512_p5 }
  0x17   :  { %522 = shalt.err (!%p519_p9)
}
  0x18   :  { %s553_s22 = smov 64   ;;  %s554_s23 = smov 4  }
  0x19   :  { %34 = dma.hbm_to_vmem [thread:$0]  %s593_s1, 3072, %s29_s20, [#allocation6], %s553_s22, %s553_s22, %s554_s23  }
  0x1a   :  { %543 = dma.done.wait [#allocation3], 384  }
  0x1b   :  { %544 = vsyncadd [#allocation3], 4294966912 }
  0x1c   :  { %545 = dma.done.wait [#allocation6], 3072  }
  0x1d   :  { %546 = vsyncadd [#allocation6], 4294964224  ;;  %v555_v0 = vmov 0.0   ;;  %vm556_vm0 = vmmov 0   ;;  %v455_v1 = vld [vmem:[#allocation5 + $0x78] sm:$0xff]   ;;  %v458_v4 = vld [vmem:[#allocation5 + $0x70] sm:$0xff]  }
  0x1e   :  { %424 = vmatprep.subr.bf16.mxu1 %v555_v0  ;;  %440 = vmatprep.mubr.msk.bf16.mxu1 %vm556_vm0, %v555_v0  ;;  %v456_v2 = vld [vmem:[#allocation5 + $0x38] sm:$0xff]   ;;  %v459_v5 = vld [vmem:[#allocation5 + $0x30] sm:$0xff]   ;;  %v461_v7 = vld [vmem:[#allocation5 + $0x68] sm:$0xff]   ;;  %s557_s26 = smov [#allocation7]  }
  0x1f   :  { %393 = vmatprep.subr.bf16.mxu0 %v455_v1  ;;  %v457_v3 = vld [vmem:[#allocation5 + $0xb8] sm:$0xff]   ;;  %v460_v6 = vld [vmem:[#allocation5 + $0xb0] sm:$0xff]   ;;  %v462_v8 = vld [vmem:[#allocation5 + $0x28] sm:$0xff]   ;;  %s352_s27 = sshll.u32 %s557_s26, 4  ;;  %s353_s27 = int_to_ptr.vmem [resolvable:$true] %s352_s27 }
  0x20   :  { %394 = vmatpush3.bf16.msra.mxu0 %v456_v2  ;;  %425 = vmatpush3.bf16.msra.mxu1 %v457_v3  ;;  %v463_v9 = vld [vmem:[#allocation5 + $0xa8] sm:$0xff]   ;;  %v464_v10 = vld [vmem:[#allocation5 + $0x60] sm:$0xff]   ;;  %v467_v13 = vld [vmem:[#allocation5 + $0x58] sm:$0xff]   ;;  %s523_s28 = scalar_lea.vmem %s353_s27, 256  ;;  %p528_p11 = scmp.lt.s32.totalorder %s353_s27, %s353_s27 }
  0x21   :  { %395 = vmatprep.subr.bf16.mxu0 %v458_v4  ;;  %426 = vmatprep.subr.bf16.mxu1 %v555_v0  ;;  %v465_v11 = vld [vmem:[#allocation5 + $0x20] sm:$0xff]   ;;  %v468_v14 = vld [vmem:[#allocation5 + $0x18] sm:$0xff]   ;;  %v470_v16 = vld [vmem:[#allocation5 + $0x50] sm:$0xff]   ;;  %p524_p10 = scmp.ne.s32.totalorder %s353_s27, %s523_s28  ;;  %p529_p12 = scmp.lt.s32.totalorder %s523_s28, %s523_s28 }
  0x22   :  { %v466_v12 = vld [vmem:[#allocation5 + $0xa0] sm:$0xff]   ;;  %v469_v15 = vld [vmem:[#allocation5 + $0x98] sm:$0xff]   ;;  %v471_v17 = vld [vmem:[#allocation5 + $0x10] sm:$0xff]  }
  0x23   :  { %v472_v18 = vld [vmem:[#allocation5 + $0x90] sm:$0xff]   ;;  %v473_v19 = vld [vmem:[#allocation5 + $0x48] sm:$0xff]   ;;  %v476_v22 = vld [vmem:[#allocation5 + $0x40] sm:$0xff]   ;;  %p530_p13 = por %p529_p12, %p528_p11 }
  0x24   :  { %396 = vmatpush3.bf16.msra.mxu0 %v459_v5  ;;  %427 = vmatpush3.bf16.msra.mxu1 %v460_v6  ;;  %v474_v20 = vld [vmem:[#allocation5 + $0x8] sm:$0xff]   ;;  %v477_v24 = vld [vmem:[#allocation5] sm:$0xff]   ;;  %v482_v27 = vld [vmem:[#allocation2 + $0x8] ss:$12 sps:$4 sm:$0xff]  }
  0x25   :  { %397 = vmatprep.subr.bf16.mxu0 %v461_v7  ;;  %428 = vmatprep.subr.bf16.mxu1 %v555_v0  ;;  %v475_v21 = vld [vmem:[#allocation5 + $0x88] sm:$0xff]   ;;  %v478_v25 = vld [vmem:[#allocation5 + $0x80] sm:$0xff]   ;;  %p531_p0 = pnand %p530_p13, %p524_p10 }
  0x26   :  { %v481_v23 = vld [vmem:[#allocation2 + $0x4] ss:$12 sps:$4 sm:$0xff]   ;;  %v479_v26 = vld [vmem:[#allocation2] ss:$12 sps:$4 sm:$0xff]  }
  0x27   :  { %295 = vmatprep.mubr.bf16.mxu0 %v481_v23  ;;  %v365_v30 = vld [vmem:[%s594_s2] ss:$0 sm:$0xff] }
  0x28   :  { %398 = vmatpush3.bf16.msra.mxu0 %v462_v8  ;;  %429 = vmatpush3.bf16.msra.mxu1 %v463_v9 }
  0x29   :  { %399 = vmatprep.subr.bf16.mxu0 %v464_v10  ;;  %430 = vmatprep.subr.bf16.mxu1 %v555_v0 }
  0x2c   :  { %400 = vmatpush3.bf16.msra.mxu0 %v465_v11  ;;  %431 = vmatpush3.bf16.msra.mxu1 %v466_v12 }
  0x2d   :  { %401 = vmatprep.subr.bf16.mxu0 %v467_v13  ;;  %432 = vmatprep.subr.bf16.mxu1 %v555_v0 }
  0x30   :  { %402 = vmatpush3.bf16.msra.mxu0 %v468_v14  ;;  %433 = vmatpush3.bf16.msra.mxu1 %v469_v15 }
  0x31   :  { %403 = vmatprep.subr.bf16.mxu0 %v470_v16  ;;  %434 = vmatprep.subr.bf16.mxu1 %v555_v0 }
  0x34   :  { %404 = vmatpush3.bf16.msra.mxu0 %v471_v17  ;;  %435 = vmatpush3.bf16.msra.mxu1 %v472_v18 }
  0x35   :  { %405 = vmatprep.subr.bf16.mxu0 %v473_v19  ;;  %436 = vmatprep.subr.bf16.mxu1 %v555_v0 }
  0x38   :  { %406 = vmatpush3.bf16.msra.mxu0 %v474_v20  ;;  %437 = vmatpush3.bf16.msra.mxu1 %v475_v21 }
  0x39   :  { %407 = vmatprep.subr.bf16.mxu0 %v476_v22  ;;  %438 = vmatprep.subr.bf16.mxu1 %v555_v0 }
  0x3c   :  { %408 = vmatpush3.bf16.msra.mxu0 %v477_v24  ;;  %439 = vmatpush3.bf16.msra.mxu1 %v478_v25 }
  0x3f   :  { %296 = vmatmul.mubr.bf16.vlgmr.msra.gmra.mxu0 %v479_v26  ;;  %441 = vmatmul.mubr.bf16.vlgmr.msra.gmra.mxu1 %v482_v27 }
  0xff   :  { %v409_v28 = vpop.f32.mrf.mxu0  ;;  %v338_v29 = vpop.f32.mrf.mxu1 }
 0x101   :  { %v410_v31 = vpop.f32.mrf.mxu0  ;;  %v442_v33 = vpop.f32.mrf.mxu1 }
 0x102   :  { %v411_v32 = vadd.f32 %v410_v31, %v409_v28 }
 0x103   :  { %v412_v34 = vpop.f32.mrf.mxu0  ;;  %v341_v36 = vpop.f32.mrf.mxu1 }
 0x104   :  { %v298_v35 = vadd.f32 %v411_v32, %v365_v30 }
 0x105   :  { %v413_v37 = vpop.f32.mrf.mxu0  ;;  %v443_v40 = vpop.f32.mrf.mxu1 }
 0x106   :  { %v339_v38 = vadd.f32 %v338_v29, %v298_v35  ;;  %v414_v39 = vadd.f32 %v413_v37, %v412_v34 }
 0x108   :  { %345 = vst [vmem:[#allocation7] sm:$0xff] %v339_v38  ;;  %v301_v41 = vadd.f32 %v414_v39, %v365_v30 }
 0x10a   :  { %v342_v42 = vadd.f32 %v341_v36, %v301_v41 }
 0x10c   :  { %346 = vst [vmem:[#allocation7 + $0x8] sm:$0xff] %v342_v42 }
 0x10d   :  { %534 = shalt.err (!%p531_p0)
}
 0x10e   :  { %s558_s2 = smov 128   ;;  %s559_s29 = smov 8  }
 0x10f   :  { %358 = dma.vmem_to_hbm [thread:$0]  %s353_s27, 256, %s595_s3, [#allocation4], %s558_s2, %s558_s2, %s559_s29  }
 0x110   :  { %547 = dma.done.wait [#allocation4], 256  }
 0x111   :  { %548 = vsyncadd [#allocation4], 4294967040 }
 0x112   :  { %362 = vsyncpa [#allocation3], 1 }
 0x113   :  { %363 = vsyncpa [#allocation6], 1 }
 0x114   :  { %364 = vsyncpa [#allocation4], 1 }

</bundles_post_ra>
